<compile_context>
chip_gen: v6e
topology: v6e:2x2x1
jax: 0.10.0
libtpu: 0.0.40
codegen_flags: <defaults>
</compile_context>

<pallas_src>
import functools

import jax
import jax.numpy as jnp
from jax import lax
from jax.experimental import pallas as pl
from jax.experimental.pallas import tpu as pltpu

FEAT_DIM = 512      # resnet18 feature dim, hardcoded in DBC.__init__
LANE = 128          # pad tiny class/pair dims up to the TPU lane width
BATCH_TILE = 32     # batch rows per grid step (sweep 32-64)
NEG_INF = -1e30     # logit padding so softmax gives padded classes zero mass


def _round_up(n, m):
    return ((n + m - 1) // m) * m


# ----------------------------------------------------------------------------
# Fused kernel: one grid step = one batch tile, everything stays in VMEM.
# ----------------------------------------------------------------------------
def dbc_fused_kernel(x_ref, cw_ref, es_ref, esh_ref,
                     dw_ref, ds_ref, dsh_ref,
                     cfw_ref, cfb_ref, aoh_ref, ooh_ref,
                     out_ref, *, a_pad, p_pad):
    tb = x_ref.shape[0]
    hw = x_ref.shape[2]
    e_dim = cw_ref.shape[0]
    inv_hw = 1.0 / hw

    # ---- img_embedder (1x1 conv + BN2d + ReLU) + adaptive avg pool ---------
    # NCHW layout kept: per batch row compute W @ x_b -> (E, HW), affine BN
    # along sublanes, ReLU, mean over the lane (pixel) axis.  The loop is a
    # fori_loop (bounded live ranges at TB=32); BN broadcasts hoisted once.
    w = cw_ref[...]                                              # (E, C) bf16
    scale_b = jnp.broadcast_to(es_ref[...], (e_dim, hw))         # (E, HW) f32
    shift_b = jnp.broadcast_to(esh_ref[...], (e_dim, hw))
    lane_ids = lax.broadcasted_iota(jnp.int32, (1, tb), 1)       # column selector

    def embed_row(b, feat_t):
        xb = x_ref[b]                                            # (C, HW) bf16, dyn idx
        y = jnp.dot(w, xb, preferred_element_type=jnp.float32)   # (E, HW) f32
        y = jnp.maximum(y * scale_b + shift_b, 0.0)              # BN2d (eval) + ReLU
        col = jnp.sum(y, axis=1, keepdims=True) * inv_hw         # (E, 1) pooled
        return jnp.where(lane_ids == b, col, feat_t)             # place column b

    feat_t = lax.fori_loop(0, tb, embed_row,
                           jnp.zeros((e_dim, tb), jnp.float32),
                           unroll=min(4, tb))
    feat = feat_t.T                                              # (TB, E), stays in VMEM

    # ---- disentanglers da|do fused into one (E, 2E) matmul ------------------
    # Linear -> BN1d (eval) -> ReLU; dropout = identity in eval; the Linear
    # bias is pre-folded into the BN shift.
    h = jnp.dot(feat.astype(jnp.bfloat16), dw_ref[...],
                preferred_element_type=jnp.float32)              # (TB, 2E)
    h = jnp.maximum(h * ds_ref[...] + dsh_ref[...], 0.0)

    # ---- attr_clf | obj_clf fused into one block-diagonal matmul ------------
    logits = jnp.dot(h.astype(jnp.bfloat16), cfw_ref[...],
                     preferred_element_type=jnp.float32) + cfb_ref[...]

    def softmax(z):
        m = jnp.max(z, axis=-1, keepdims=True)
        e = jnp.exp(z - m)
        # approx reciprocal -> EUP slot; rows normalized to ~1e-3 (eval scoring)
        return e * pl.reciprocal(jnp.sum(e, axis=-1, keepdims=True), approx=True)

    attr_pred = softmax(logits[:, :a_pad])                       # (TB, Apad) f32
    obj_pred = softmax(logits[:, a_pad:])                        # (TB, Opad) f32

    # ---- pair scores: one-hot gather matmuls, kept in f32 (exact selection) --
    sa = jnp.dot(attr_pred, aoh_ref[...], preferred_element_type=jnp.float32)
    so = jnp.dot(obj_pred, ooh_ref[...], preferred_element_type=jnp.float32)

    # Lane-dense slab: [scores_pad | attr_pred_pad | obj_pred_pad], direct stores
    out_ref[:, :p_pad] = sa * so
    out_ref[:, p_pad:p_pad + a_pad] = attr_pred
    out_ref[:, p_pad + a_pad:] = obj_pred


# ----------------------------------------------------------------------------
# Wrapper
# ----------------------------------------------------------------------------
def _pick_batch_tile(B, batch_tile):
    batch_tile = max(8, (batch_tile // 8) * 8)      # keep sublane-aligned tiles
    if B <= 8:
        return B                                    # single tile == full array dim
    # >= 2 grid steps when possible (v7x shards "parallel" grid over its 2 TCs)
    return min(batch_tile, _round_up(pl.cdiv(B, 2), 8))


def dbc_val_forward(x_nchw, packed, *, batch_tile=BATCH_TILE):
    B, C, H, W = x_nchw.shape
    HW = H * W
    E, A, O, Pn, Ap, Op, Pp = packed["dims"]
    n_cls = Ap + Op
    n_out = Pp + Ap + Op

    tb = _pick_batch_tile(B, batch_tile)
    num_tiles = pl.cdiv(B, tb)

    # bf16 feature map: halves the bytes of the dominant (HBM-bound) input.
    # No jnp.pad: the last partial tile's out-of-range rows are garbage and
    # their output writes are masked by Pallas (all per-row math independent).
    x = x_nchw.astype(jnp.bfloat16).reshape(B, C, HW)   # NCHW stays contiguous

    const = lambda shape: pl.BlockSpec(shape, lambda i: (0,) * len(shape))

    out = pl.pallas_call(
        functools.partial(dbc_fused_kernel, a_pad=Ap, p_pad=Pp),
        out_shape=jax.ShapeDtypeStruct((B, n_out), jnp.float32),
        grid=(num_tiles,),
        in_specs=[
            pl.BlockSpec((tb, C, HW), lambda i: (i, 0, 0)),   # feature map tile (bf16)
            const((E, C)),                                    # conv_w (bf16)
            const((E, 1)), const((E, 1)),                     # BN2d scale/shift
            const((E, 2 * E)),                                # merged da|do weight (bf16)
            const((1, 2 * E)), const((1, 2 * E)),             # BN1d scale / (bias-folded) shift
            const((2 * E, n_cls)), const((1, n_cls)),         # block-diag clf weight/bias
            const((Ap, Pp)), const((Op, Pp)),                 # one-hot gather matrices (f32)
        ],
        out_specs=pl.BlockSpec((tb, n_out), lambda i: (i, 0)),
        compiler_params=pltpu.CompilerParams(
            dimension_semantics=("parallel",),
            vmem_limit_bytes=32 * 1024 * 1024),
    )(x,
      packed["conv_w"], packed["emb_scale"], packed["emb_shift"],
      packed["d_w"], packed["d_scale"], packed["d_shift"],
      packed["clf_w"], packed["clf_b"],
      packed["attr_oh"], packed["obj_oh"])

    scores = out[:, :Pn]
    attr_pred = out[:, Pp:Pp + A]
    obj_pred = out[:, Pp + Ap:Pp + Ap + O]
    return scores, attr_pred, obj_pred


# ----------------------------------------------------------------------------
# Parameter construction / packing + plain-JAX reference
# ----------------------------------------------------------------------------
def fold_bn(gamma, beta, mean, var, eps=1e-5):
    scale = gamma / jnp.sqrt(var + eps)
    shift = beta - mean * scale
    return scale.reshape(1, -1), shift.reshape(1, -1)


def make_params(key, emb_dim, n_attrs, n_objs):
    ks = jax.random.split(key, 20)
    p = {}
    # img_embedder: Conv2d(512, E, 1, bias=False) + BatchNorm2d(E)
    p["conv_w"] = jax.random.normal(ks[0], (FEAT_DIM, emb_dim), jnp.float32) * 0.02
    p["emb_scale"], p["emb_shift"] = fold_bn(
        1.0 + 0.1 * jax.random.normal(ks[1], (emb_dim,)),
        0.1 * jax.random.normal(ks[2], (emb_dim,)),
        0.05 * jax.random.normal(ks[3], (emb_dim,)),
        jnp.abs(jax.random.normal(ks[4], (emb_dim,))) + 0.5,
    )
    # Disentangler da / do: Linear(E,E) + BatchNorm1d(E)
    for name, k0 in (("da", 5), ("do", 9)):
        p[f"{name}_w"] = jax.random.normal(ks[k0], (emb_dim, emb_dim)) * 0.1
        p[f"{name}_b"] = (0.01 * jax.random.normal(ks[k0 + 1], (emb_dim,))).reshape(1, -1)
        p[f"{name}_scale"], p[f"{name}_shift"] = fold_bn(
            jnp.ones((emb_dim,)), jnp.zeros((emb_dim,)),
            0.05 * jax.random.normal(ks[k0 + 2], (emb_dim,)),
            jnp.abs(jax.random.normal(ks[k0 + 3], (emb_dim,))) + 0.5,
        )
    # attr_clf / obj_clf: MLP(E, n, num_layers=1, relu=False) == single Linear
    p["attr_w"] = jax.random.normal(ks[13], (emb_dim, n_attrs)) * 0.1
    p["attr_b"] = (0.01 * jax.random.normal(ks[14], (n_attrs,))).reshape(1, -1)
    p["obj_w"] = jax.random.normal(ks[15], (emb_dim, n_objs)) * 0.1
    p["obj_b"] = (0.01 * jax.random.normal(ks[16], (n_objs,))).reshape(1, -1)
    return p


def pack_params(p, pair_attrs, pair_objs, n_attrs, n_objs):
    """One-time packing: bf16 matmul weights, merged heads, padded one-hots."""
    E = p["conv_w"].shape[1]
    A, O = n_attrs, n_objs
    Pn = int(pair_attrs.shape[0])
    Ap, Op, Pp = _round_up(A, LANE), _round_up(O, LANE), _round_up(Pn, LANE)

    packed = {"dims": (E, A, O, Pn, Ap, Op, Pp)}
    packed["conv_w"] = p["conv_w"].T.astype(jnp.bfloat16)          # (E, C)
    packed["emb_scale"] = p["emb_scale"].reshape(E, 1)
    packed["emb_shift"] = p["emb_shift"].reshape(E, 1)

    # merged disentangler (E, 2E); Linear bias folded into BN shift
    d_scale = jnp.concatenate([p["da_scale"], p["do_scale"]], axis=1)
    d_shift = jnp.concatenate([p["da_shift"], p["do_shift"]], axis=1)
    d_bias = jnp.concatenate([p["da_b"], p["do_b"]], axis=1)
    packed["d_w"] = jnp.concatenate([p["da_w"], p["do_w"]], axis=1).astype(jnp.bfloat16)
    packed["d_scale"] = d_scale
    packed["d_shift"] = d_bias * d_scale + d_shift

    # merged block-diagonal classifier (2E, Ap+Op); padded columns get -1e30 bias
    clf_w = jnp.zeros((2 * E, Ap + Op), jnp.float32)
    clf_w = clf_w.at[:E, :A].set(p["attr_w"])
    clf_w = clf_w.at[E:, Ap:Ap + O].set(p["obj_w"])
    packed["clf_w"] = clf_w.astype(jnp.bfloat16)
    clf_b = jnp.full((1, Ap + Op), NEG_INF, jnp.float32)
    clf_b = clf_b.at[0, :A].set(p["attr_b"][0])
    clf_b = clf_b.at[0, Ap:Ap + O].set(p["obj_b"][0])
    packed["clf_b"] = clf_b

    # one-hot gather matrices kept f32 (exact selection), zero-padded rows/cols
    packed["attr_oh"] = jnp.zeros((Ap, Pp), jnp.float32).at[
        pair_attrs, jnp.arange(Pn)].set(1.0)
    packed["obj_oh"] = jnp.zeros((Op, Pp), jnp.float32).at[
        pair_objs, jnp.arange(Pn)].set(1.0)
    return packed


def reference_forward(x_nchw, p, pair_attrs, pair_objs):
    B, C, H, W = x_nchw.shape
    x = jnp.transpose(x_nchw, (0, 2, 3, 1)).reshape(B, H * W, C)
    y = jnp.einsum("bpc,ce->bpe", x, p["conv_w"],
                   preferred_element_type=jnp.float32)
    y = jnp.maximum(y * p["emb_scale"] + p["emb_shift"], 0.0)
    feat = jnp.mean(y, axis=1)

    def dis(name):
        h = feat @ p[f"{name}_w"] + p[f"{name}_b"]
        return jnp.maximum(h * p[f"{name}_scale"] + p[f"{name}_shift"], 0.0)

    attr_pred = jax.nn.softmax(dis("da") @ p["attr_w"] + p["attr_b"], axis=1)
    obj_pred = jax.nn.softmax(dis("do") @ p["obj_w"] + p["obj_b"], axis=1)
    scores = attr_pred[:, pair_attrs] * obj_pred[:, pair_objs]
    return scores, attr_pred, obj_pred


# ----------------------------------------------------------------------------
if __name__ == "__main__":
    B, H, W = 2, 8, 8
    emb_dim = 32
    n_attrs, n_objs, n_pairs = 10, 12, 20

    key = jax.random.PRNGKey(0)
    kx, kp = jax.random.split(key)
    x = jax.random.normal(kx, (B, FEAT_DIM, H, W), jnp.float32)  # backbone feat map (NCHW)
    params = make_params(kp, emb_dim, n_attrs, n_objs)

    # deterministic synthetic (attr, obj) pair table (stand-in for dset.pairs)
    pair_attrs = jnp.arange(n_pairs, dtype=jnp.int32) % n_attrs
    pair_objs = (jnp.arange(n_pairs, dtype=jnp.int32) * 3) % n_objs

    packed = pack_params(params, pair_attrs, pair_objs, n_attrs, n_objs)
    scores, attr_pred, obj_pred = dbc_val_forward(x, packed)
    jax.block_until_ready(scores)

    # correctness check vs. plain-JAX reference
    ref_scores, ref_ap, ref_op = reference_forward(x, params, pair_attrs, pair_objs)
    assert scores.shape == (B, n_pairs)
    assert jnp.allclose(scores, ref_scores, atol=2e-2, rtol=2e-2)
    assert jnp.allclose(attr_pred, ref_ap, atol=2e-2, rtol=2e-2)
    assert jnp.allclose(obj_pred, ref_op, atol=2e-2, rtol=2e-2)

    print("KERNEL_OK")
</pallas_src>

<mosaic_0001>
module attributes {stable_mosaic.version = 11 : i64} {
  func.func @dbc_fused_kernel(%arg0: i32, %arg1: memref<2x512x64xbf16, #tpu.memory_space<vmem>>, %arg2: memref<32x512xbf16, #tpu.memory_space<vmem>>, %arg3: memref<32x1xf32, #tpu.memory_space<vmem>>, %arg4: memref<32x1xf32, #tpu.memory_space<vmem>>, %arg5: memref<32x64xbf16, #tpu.memory_space<vmem>>, %arg6: memref<1x64xf32, #tpu.memory_space<vmem>>, %arg7: memref<1x64xf32, #tpu.memory_space<vmem>>, %arg8: memref<64x256xbf16, #tpu.memory_space<vmem>>, %arg9: memref<1x256xf32, #tpu.memory_space<vmem>>, %arg10: memref<128x128xf32, #tpu.memory_space<vmem>>, %arg11: memref<128x128xf32, #tpu.memory_space<vmem>>, %arg12: memref<2x384xf32, #tpu.memory_space<vmem>>) attributes {dimension_semantics = [#tpu.dimension_semantics<parallel>], iteration_bounds = array<i64: 1>, scalar_prefetch = 0 : i64, scratch_operands = 0 : i64, tpu.core_type = #tpu.core_type<tc>, window_params = [{transform_indices = @transform_0, window_bounds = array<i64: 2, 512, 64>}, {pipeline_mode = #tpu.pipeline_mode<synchronous>, transform_indices = @transform_1, window_bounds = array<i64: 32, 512>}, {pipeline_mode = #tpu.pipeline_mode<synchronous>, transform_indices = @transform_2, window_bounds = array<i64: 32, 1>}, {pipeline_mode = #tpu.pipeline_mode<synchronous>, transform_indices = @transform_3, window_bounds = array<i64: 32, 1>}, {pipeline_mode = #tpu.pipeline_mode<synchronous>, transform_indices = @transform_4, window_bounds = array<i64: 32, 64>}, {pipeline_mode = #tpu.pipeline_mode<synchronous>, transform_indices = @transform_5, window_bounds = array<i64: 1, 64>}, {pipeline_mode = #tpu.pipeline_mode<synchronous>, transform_indices = @transform_6, window_bounds = array<i64: 1, 64>}, {pipeline_mode = #tpu.pipeline_mode<synchronous>, transform_indices = @transform_7, window_bounds = array<i64: 64, 256>}, {pipeline_mode = #tpu.pipeline_mode<synchronous>, transform_indices = @transform_8, window_bounds = array<i64: 1, 256>}, {pipeline_mode = #tpu.pipeline_mode<synchronous>, transform_indices = @transform_9, window_bounds = array<i64: 128, 128>}, {pipeline_mode = #tpu.pipeline_mode<synchronous>, transform_indices = @transform_10, window_bounds = array<i64: 128, 128>}, {transform_indices = @transform_11, window_bounds = array<i64: 2, 384>}]} {
    %c0 = arith.constant 0 : index
    %c0_0 = arith.constant 0 : index
    %0 = vector.load %arg2[%c0, %c0_0] : memref<32x512xbf16, #tpu.memory_space<vmem>>, vector<32x512xbf16>
    %c0_1 = arith.constant 0 : index
    %c0_2 = arith.constant 0 : index
    %1 = vector.load %arg3[%c0_1, %c0_2] : memref<32x1xf32, #tpu.memory_space<vmem>>, vector<32x1xf32>
    %2 = vector.shape_cast %1 : vector<32x1xf32> to vector<32x1xf32>
    %3 = vector.broadcast %2 : vector<32x1xf32> to vector<32x64xf32>
    %c0_3 = arith.constant 0 : index
    %c0_4 = arith.constant 0 : index
    %4 = vector.load %arg4[%c0_3, %c0_4] : memref<32x1xf32, #tpu.memory_space<vmem>>, vector<32x1xf32>
    %5 = vector.shape_cast %4 : vector<32x1xf32> to vector<32x1xf32>
    %6 = vector.broadcast %5 : vector<32x1xf32> to vector<32x64xf32>
    %7 = tpu.iota {dimensions = array<i32: 1>} : vector<1x2xi32>
    %cst = arith.constant 0.000000e+00 : f32
    %8 = vector.broadcast %cst : f32 to vector<32x2xf32>
    %c0_i32 = arith.constant 0 : i32
    %9 = arith.index_cast %c0_i32 : i32 to index
    %c0_5 = arith.constant 0 : index
    %c0_6 = arith.constant 0 : index
    %10 = vector.load %arg1[%9, %c0_5, %c0_6] : memref<2x512x64xbf16, #tpu.memory_space<vmem>>, vector<1x512x64xbf16>
    %11 = vector.shape_cast %10 : vector<1x512x64xbf16> to vector<512x64xbf16>
    %cst_7 = arith.constant dense<0.000000e+00> : vector<32x64xf32>
    %12 = tpu.matmul %0, %11, %cst_7 {dimension_numbers = #tpu.dot_dimension_numbers<[1], [0], [0], [1], [0, 0, 1, 1], [], []>} : vector<32x512xbf16>, vector<512x64xbf16>, vector<32x64xf32> -> vector<32x64xf32>
    %13 = arith.mulf %12, %3 : vector<32x64xf32>
    %14 = arith.addf %13, %6 : vector<32x64xf32>
    %cst_8 = arith.constant 0.000000e+00 : f32
    %15 = vector.broadcast %cst_8 : f32 to vector<32x64xf32>
    %16 = arith.maximumf %14, %15 : vector<32x64xf32>
    %cst_9 = arith.constant dense<0.000000e+00> : vector<32xf32>
    %17 = vector.multi_reduction <add>, %16, %cst_9 [1] : vector<32x64xf32> to vector<32xf32>
    %18 = vector.shape_cast %17 : vector<32xf32> to vector<32x1xf32>
    %cst_10 = arith.constant 1.562500e-02 : f32
    %19 = vector.broadcast %cst_10 : f32 to vector<32x1xf32>
    %20 = arith.mulf %18, %19 : vector<32x1xf32>
    %21 = vector.broadcast %c0_i32 : i32 to vector<1x2xi32>
    %22 = arith.cmpi eq, %7, %21 : vector<1x2xi32>
    %23 = vector.shape_cast %22 : vector<1x2xi1> to vector<1x2xi1>
    %24 = vector.broadcast %23 : vector<1x2xi1> to vector<32x2xi1>
    %25 = vector.shape_cast %20 : vector<32x1xf32> to vector<32x1xf32>
    %26 = vector.broadcast %25 : vector<32x1xf32> to vector<32x2xf32>
    %27 = arith.select %24, %26, %8 : vector<32x2xi1>, vector<32x2xf32>
    %c1_i32 = arith.constant 1 : i32
    %28 = arith.index_cast %c1_i32 : i32 to index
    %c0_11 = arith.constant 0 : index
    %c0_12 = arith.constant 0 : index
    %29 = vector.load %arg1[%28, %c0_11, %c0_12] : memref<2x512x64xbf16, #tpu.memory_space<vmem>>, vector<1x512x64xbf16>
    %30 = vector.shape_cast %29 : vector<1x512x64xbf16> to vector<512x64xbf16>
    %cst_13 = arith.constant dense<0.000000e+00> : vector<32x64xf32>
    %31 = tpu.matmul %0, %30, %cst_13 {dimension_numbers = #tpu.dot_dimension_numbers<[1], [0], [0], [1], [0, 0, 1, 1], [], []>} : vector<32x512xbf16>, vector<512x64xbf16>, vector<32x64xf32> -> vector<32x64xf32>
    %32 = arith.mulf %31, %3 : vector<32x64xf32>
    %33 = arith.addf %32, %6 : vector<32x64xf32>
    %cst_14 = arith.constant 0.000000e+00 : f32
    %34 = vector.broadcast %cst_14 : f32 to vector<32x64xf32>
    %35 = arith.maximumf %33, %34 : vector<32x64xf32>
    %cst_15 = arith.constant dense<0.000000e+00> : vector<32xf32>
    %36 = vector.multi_reduction <add>, %35, %cst_15 [1] : vector<32x64xf32> to vector<32xf32>
    %37 = vector.shape_cast %36 : vector<32xf32> to vector<32x1xf32>
    %cst_16 = arith.constant 1.562500e-02 : f32
    %38 = vector.broadcast %cst_16 : f32 to vector<32x1xf32>
    %39 = arith.mulf %37, %38 : vector<32x1xf32>
    %40 = vector.broadcast %c1_i32 : i32 to vector<1x2xi32>
    %41 = arith.cmpi eq, %7, %40 : vector<1x2xi32>
    %42 = vector.shape_cast %41 : vector<1x2xi1> to vector<1x2xi1>
    %43 = vector.broadcast %42 : vector<1x2xi1> to vector<32x2xi1>
    %44 = vector.shape_cast %39 : vector<32x1xf32> to vector<32x1xf32>
    %45 = vector.broadcast %44 : vector<32x1xf32> to vector<32x2xf32>
    %46 = arith.select %43, %45, %27 : vector<32x2xi1>, vector<32x2xf32>
    %c2_i32 = arith.constant 2 : i32
    %47 = tpu.transpose %46, [1, 0] : vector<32x2xf32> -> vector<2x32xf32>
    %48 = arith.truncf %47 : vector<2x32xf32> to vector<2x32xbf16>
    %c0_17 = arith.constant 0 : index
    %c0_18 = arith.constant 0 : index
    %49 = vector.load %arg5[%c0_17, %c0_18] : memref<32x64xbf16, #tpu.memory_space<vmem>>, vector<32x64xbf16>
    %cst_19 = arith.constant dense<0.000000e+00> : vector<2x64xf32>
    %50 = tpu.matmul %48, %49, %cst_19 {dimension_numbers = #tpu.dot_dimension_numbers<[1], [0], [0], [1], [0, 0, 1, 1], [], []>} : vector<2x32xbf16>, vector<32x64xbf16>, vector<2x64xf32> -> vector<2x64xf32>
    %c0_20 = arith.constant 0 : index
    %c0_21 = arith.constant 0 : index
    %51 = vector.load %arg6[%c0_20, %c0_21] : memref<1x64xf32, #tpu.memory_space<vmem>>, vector<1x64xf32>
    %52 = vector.broadcast %51 : vector<1x64xf32> to vector<2x64xf32>
    %53 = arith.mulf %50, %52 : vector<2x64xf32>
    %c0_22 = arith.constant 0 : index
    %c0_23 = arith.constant 0 : index
    %54 = vector.load %arg7[%c0_22, %c0_23] : memref<1x64xf32, #tpu.memory_space<vmem>>, vector<1x64xf32>
    %55 = vector.broadcast %54 : vector<1x64xf32> to vector<2x64xf32>
    %56 = arith.addf %53, %55 : vector<2x64xf32>
    %cst_24 = arith.constant 0.000000e+00 : f32
    %57 = vector.broadcast %cst_24 : f32 to vector<2x64xf32>
    %58 = arith.maximumf %56, %57 : vector<2x64xf32>
    %59 = arith.truncf %58 : vector<2x64xf32> to vector<2x64xbf16>
    %c0_25 = arith.constant 0 : index
    %c0_26 = arith.constant 0 : index
    %60 = vector.load %arg8[%c0_25, %c0_26] : memref<64x256xbf16, #tpu.memory_space<vmem>>, vector<64x256xbf16>
    %cst_27 = arith.constant dense<0.000000e+00> : vector<2x256xf32>
    %61 = tpu.matmul %59, %60, %cst_27 {dimension_numbers = #tpu.dot_dimension_numbers<[1], [0], [0], [1], [0, 0, 1, 1], [], []>} : vector<2x64xbf16>, vector<64x256xbf16>, vector<2x256xf32> -> vector<2x256xf32>
    %c0_28 = arith.constant 0 : index
    %c0_29 = arith.constant 0 : index
    %62 = vector.load %arg9[%c0_28, %c0_29] : memref<1x256xf32, #tpu.memory_space<vmem>>, vector<1x256xf32>
    %63 = vector.broadcast %62 : vector<1x256xf32> to vector<2x256xf32>
    %64 = arith.addf %61, %63 : vector<2x256xf32>
    %65 = vector.extract_strided_slice %64 {offsets = [0, 0], sizes = [2, 128], strides = [1, 1]} : vector<2x256xf32> to vector<2x128xf32>
    %cst_30 = arith.constant dense<0xFF800000> : vector<2xf32>
    %66 = vector.multi_reduction <maximumf>, %65, %cst_30 [1] : vector<2x128xf32> to vector<2xf32>
    %67 = vector.shape_cast %66 : vector<2xf32> to vector<2x1xf32>
    %68 = vector.broadcast %67 : vector<2x1xf32> to vector<2x128xf32>
    %69 = arith.subf %65, %68 : vector<2x128xf32>
    %70 = math.exp %69 : vector<2x128xf32>
    %cst_31 = arith.constant dense<0.000000e+00> : vector<2xf32>
    %71 = vector.multi_reduction <add>, %70, %cst_31 [1] : vector<2x128xf32> to vector<2xf32>
    %72 = vector.shape_cast %71 : vector<2xf32> to vector<2x1xf32>
    %73 = tpu.reciprocal %72 {approx = true} : vector<2x1xf32> -> vector<2x1xf32>
    %74 = vector.broadcast %73 : vector<2x1xf32> to vector<2x128xf32>
    %75 = arith.mulf %70, %74 : vector<2x128xf32>
    %76 = vector.extract_strided_slice %64 {offsets = [0, 128], sizes = [2, 128], strides = [1, 1]} : vector<2x256xf32> to vector<2x128xf32>
    %cst_32 = arith.constant dense<0xFF800000> : vector<2xf32>
    %77 = vector.multi_reduction <maximumf>, %76, %cst_32 [1] : vector<2x128xf32> to vector<2xf32>
    %78 = vector.shape_cast %77 : vector<2xf32> to vector<2x1xf32>
    %79 = vector.broadcast %78 : vector<2x1xf32> to vector<2x128xf32>
    %80 = arith.subf %76, %79 : vector<2x128xf32>
    %81 = math.exp %80 : vector<2x128xf32>
    %cst_33 = arith.constant dense<0.000000e+00> : vector<2xf32>
    %82 = vector.multi_reduction <add>, %81, %cst_33 [1] : vector<2x128xf32> to vector<2xf32>
    %83 = vector.shape_cast %82 : vector<2xf32> to vector<2x1xf32>
    %84 = tpu.reciprocal %83 {approx = true} : vector<2x1xf32> -> vector<2x1xf32>
    %85 = vector.broadcast %84 : vector<2x1xf32> to vector<2x128xf32>
    %86 = arith.mulf %81, %85 : vector<2x128xf32>
    %c0_34 = arith.constant 0 : index
    %c0_35 = arith.constant 0 : index
    %87 = vector.load %arg10[%c0_34, %c0_35] : memref<128x128xf32, #tpu.memory_space<vmem>>, vector<128x128xf32>
    %cst_36 = arith.constant dense<0.000000e+00> : vector<2x128xf32>
    %88 = tpu.matmul %75, %87, %cst_36 {dimension_numbers = #tpu.dot_dimension_numbers<[1], [0], [0], [1], [0, 0, 1, 1], [], []>} : vector<2x128xf32>, vector<128x128xf32>, vector<2x128xf32> -> vector<2x128xf32>
    %c0_37 = arith.constant 0 : index
    %c0_38 = arith.constant 0 : index
    %89 = vector.load %arg11[%c0_37, %c0_38] : memref<128x128xf32, #tpu.memory_space<vmem>>, vector<128x128xf32>
    %cst_39 = arith.constant dense<0.000000e+00> : vector<2x128xf32>
    %90 = tpu.matmul %86, %89, %cst_39 {dimension_numbers = #tpu.dot_dimension_numbers<[1], [0], [0], [1], [0, 0, 1, 1], [], []>} : vector<2x128xf32>, vector<128x128xf32>, vector<2x128xf32> -> vector<2x128xf32>
    %91 = arith.mulf %88, %90 : vector<2x128xf32>
    %c0_40 = arith.constant 0 : index
    %c0_41 = arith.constant 0 : index
    %92 = vector.load %arg12[%c0_40, %c0_41] : memref<2x384xf32, #tpu.memory_space<vmem>>, vector<2x128xf32>
    tpu.vector_store %arg12[%c0_40, %c0_41], %91 {strides = array<i32>} : memref<2x384xf32, #tpu.memory_space<vmem>>, vector<2x128xf32>,
    %c0_42 = arith.constant 0 : index
    %c128 = arith.constant 128 : index
    %93 = vector.load %arg12[%c0_42, %c128] : memref<2x384xf32, #tpu.memory_space<vmem>>, vector<2x128xf32>
    tpu.vector_store %arg12[%c0_42, %c128], %75 {strides = array<i32>} : memref<2x384xf32, #tpu.memory_space<vmem>>, vector<2x128xf32>,
    %c0_43 = arith.constant 0 : index
    %c256 = arith.constant 256 : index
    %94 = vector.load %arg12[%c0_43, %c256] : memref<2x384xf32, #tpu.memory_space<vmem>>, vector<2x128xf32>
    tpu.vector_store %arg12[%c0_43, %c256], %86 {strides = array<i32>} : memref<2x384xf32, #tpu.memory_space<vmem>>, vector<2x128xf32>,
    return
  }
  func.func @transform_0(%arg0: i32) -> (i32, i32, i32) {
    %c0_i32 = arith.constant 0 : i32
    %c0_i32_0 = arith.constant 0 : i32
    %c0_i32_1 = arith.constant 0 : i32
    return %arg0, %c0_i32, %c0_i32_0 : i32, i32, i32
  }
  func.func @transform_1(%arg0: i32) -> (i32, i32) {
    %c0_i32 = arith.constant 0 : i32
    %c0_i32_0 = arith.constant 0 : i32
    %c0_i32_1 = arith.constant 0 : i32
    return %c0_i32, %c0_i32_0 : i32, i32
  }
  func.func @transform_2(%arg0: i32) -> (i32, i32) {
    %c0_i32 = arith.constant 0 : i32
    %c0_i32_0 = arith.constant 0 : i32
    %c0_i32_1 = arith.constant 0 : i32
    return %c0_i32, %c0_i32_0 : i32, i32
  }
  func.func @transform_3(%arg0: i32) -> (i32, i32) {
    %c0_i32 = arith.constant 0 : i32
    %c0_i32_0 = arith.constant 0 : i32
    %c0_i32_1 = arith.constant 0 : i32
    return %c0_i32, %c0_i32_0 : i32, i32
  }
  func.func @transform_4(%arg0: i32) -> (i32, i32) {
    %c0_i32 = arith.constant 0 : i32
    %c0_i32_0 = arith.constant 0 : i32
    %c0_i32_1 = arith.constant 0 : i32
    return %c0_i32, %c0_i32_0 : i32, i32
  }
  func.func @transform_5(%arg0: i32) -> (i32, i32) {
    %c0_i32 = arith.constant 0 : i32
    %c0_i32_0 = arith.constant 0 : i32
    %c0_i32_1 = arith.constant 0 : i32
    return %c0_i32, %c0_i32_0 : i32, i32
  }
  func.func @transform_6(%arg0: i32) -> (i32, i32) {
    %c0_i32 = arith.constant 0 : i32
    %c0_i32_0 = arith.constant 0 : i32
    %c0_i32_1 = arith.constant 0 : i32
    return %c0_i32, %c0_i32_0 : i32, i32
  }
  func.func @transform_7(%arg0: i32) -> (i32, i32) {
    %c0_i32 = arith.constant 0 : i32
    %c0_i32_0 = arith.constant 0 : i32
    %c0_i32_1 = arith.constant 0 : i32
    return %c0_i32, %c0_i32_0 : i32, i32
  }
  func.func @transform_8(%arg0: i32) -> (i32, i32) {
    %c0_i32 = arith.constant 0 : i32
    %c0_i32_0 = arith.constant 0 : i32
    %c0_i32_1 = arith.constant 0 : i32
    return %c0_i32, %c0_i32_0 : i32, i32
  }
  func.func @transform_9(%arg0: i32) -> (i32, i32) {
    %c0_i32 = arith.constant 0 : i32
    %c0_i32_0 = arith.constant 0 : i32
    %c0_i32_1 = arith.constant 0 : i32
    return %c0_i32, %c0_i32_0 : i32, i32
  }
  func.func @transform_10(%arg0: i32) -> (i32, i32) {
    %c0_i32 = arith.constant 0 : i32
    %c0_i32_0 = arith.constant 0 : i32
    %c0_i32_1 = arith.constant 0 : i32
    return %c0_i32, %c0_i32_0 : i32, i32
  }
  func.func @transform_11(%arg0: i32) -> (i32, i32) {
    %c0_i32 = arith.constant 0 : i32
    %c0_i32_0 = arith.constant 0 : i32
    return %arg0, %c0_i32 : i32, i32
  }
}

</mosaic_0001>

<bundles_post_ra>
// kernel: tpu_custom_call.1
= control target key start
LH: loop header
LB: loop body
LE: loop exit
PB: predicated region body
PF: predicated region fallthrough
CT: control target
= control target key end

     0   :  { %v1849_v2 = vmov 0   ;;  %s2373_s0 = inlined_call_operand.vmem [shape: bf16[2,512,64], index: 0, kind: input, shape index: {}]   ;;  %s2374_s1 = inlined_call_operand.vmem [shape: bf16[32,512], index: 1, kind: input, shape index: {}]   ;;  %s2375_s2 = inlined_call_operand.vmem [shape: f32[32,1], index: 2, kind: input, shape index: {}]   ;;  %s2376_s3 = inlined_call_operand.vmem [shape: f32[32,1], index: 3, kind: input, shape index: {}]   ;;  %s2377_s4 = inlined_call_operand.vmem [shape: bf16[32,64], index: 4, kind: input, shape index: {}]   ;;  %s2378_s5 = inlined_call_operand.vmem [shape: f32[1,64], index: 5, kind: input, shape index: {}]   ;;  %s2379_s6 = inlined_call_operand.vmem [shape: f32[1,64], index: 6, kind: input, shape index: {}]   ;;  %s2380_s7 = inlined_call_operand.vmem [shape: bf16[64,256], index: 7, kind: input, shape index: {}]   ;;  %s2381_s8 = inlined_call_operand.vmem [shape: f32[1,256], index: 8, kind: input, shape index: {}]   ;;  %s2382_s9 = inlined_call_operand.vmem [shape: f32[128,128], index: 9, kind: input, shape index: {}]   ;;  %s2383_s10 = inlined_call_operand.vmem [shape: f32[128,128], index: 10, kind: input, shape index: {}]   ;;  %s2384_s11 = inlined_call_operand.hbm [shape: f32[2,384], index: 11, kind: output, shape index: {}]  }
   0x1   :  { %v1729_v0 = vld [vmem:[%s2373_s0 + $0x78] sm:$0xff]   ;;  %1727 = vset.pattern.permute.xlu0 %v1849_v2  ;;  %1728 = vset.pattern.permute.xlu1 %v1849_v2  ;;  %v1733_v5 = vld [vmem:[%s2373_s0 + $0x70] sm:$0xff]   ;;  %v1737_v9 = vld [vmem:[%s2373_s0 + $0x68] sm:$0xff]  }
   0x2   :  { %v1730_v1 = vld [vmem:[%s2373_s0 + $0xf8] sm:$0xff]   ;;  %1496 = vmatprep.subr.bf16.mxu0 %v1729_v0  ;;  %v1734_v6 = vld [vmem:[%s2373_s0 + $0xf0] sm:$0xff]   ;;  %v1738_v10 = vld [vmem:[%s2373_s0 + $0xe8] sm:$0xff]  }
   0x3   :  { %v1731_v3 = vld [vmem:[%s2373_s0 + $0x38] sm:$0xff]   ;;  %1524 = vmatprep.subr.bf16.mxu1 %v1730_v1  ;;  %v1735_v7 = vld [vmem:[%s2373_s0 + $0x30] sm:$0xff]   ;;  %v1739_v11 = vld [vmem:[%s2373_s0 + $0x28] sm:$0xff]  }
   0x4   :  { %v1732_v4 = vld [vmem:[%s2373_s0 + $0xb8] sm:$0xff]   ;;  %1497 = vmatpush3.bf16.msra.mxu0 %v1731_v3  ;;  %v1736_v8 = vld [vmem:[%s2373_s0 + $0xb0] sm:$0xff]   ;;  %v1740_v12 = vld [vmem:[%s2373_s0 + $0xa8] sm:$0xff]  }
   0x5   :  { %1525 = vmatpush3.bf16.msra.mxu1 %v1732_v4  ;;  %1498 = vmatprep.subr.bf16.mxu0 %v1733_v5  ;;  %v1741_v13 = vld [vmem:[%s2373_s0 + $0x60] sm:$0xff]   ;;  %v1745_v17 = vld [vmem:[%s2373_s0 + $0x58] sm:$0xff]   ;;  %v1749_v21 = vld [vmem:[%s2373_s0 + $0x50] sm:$0xff]  }
   0x6   :  { %1526 = vmatprep.subr.bf16.mxu1 %v1734_v6  ;;  %v1742_v14 = vld [vmem:[%s2373_s0 + $0xe0] sm:$0xff]   ;;  %v1746_v18 = vld [vmem:[%s2373_s0 + $0xd8] sm:$0xff]   ;;  %v1750_v22 = vld [vmem:[%s2373_s0 + $0xd0] sm:$0xff]  }
   0x7   :  { %v1743_v15 = vld [vmem:[%s2373_s0 + $0x20] sm:$0xff]   ;;  %v1747_v19 = vld [vmem:[%s2373_s0 + $0x18] sm:$0xff]   ;;  %v1751_v23 = vld [vmem:[%s2373_s0 + $0x10] sm:$0xff]  }
   0x8   :  { %1499 = vmatpush3.bf16.msra.mxu0 %v1735_v7  ;;  %v1744_v16 = vld [vmem:[%s2373_s0 + $0xa0] sm:$0xff]   ;;  %v1748_v20 = vld [vmem:[%s2373_s0 + $0x98] sm:$0xff]   ;;  %v1752_v24 = vld [vmem:[%s2373_s0 + $0x90] sm:$0xff]  }
   0x9   :  { %1527 = vmatpush3.bf16.msra.mxu1 %v1736_v8  ;;  %1500 = vmatprep.subr.bf16.mxu0 %v1737_v9  ;;  %v1753_v25 = vld [vmem:[%s2373_s0 + $0x48] sm:$0xff]   ;;  %v1757_v29 = vld [vmem:[%s2373_s0 + $0x40] sm:$0xff]   ;;  %v1767_v37 = vld [vmem:[%s2373_s0 + $0x178] sm:$0xff]  }
   0xa   :  { %1528 = vmatprep.subr.bf16.mxu1 %v1738_v10  ;;  %v1754_v26 = vld [vmem:[%s2373_s0 + $0xc8] sm:$0xff]   ;;  %v1758_v30 = vld [vmem:[%s2373_s0 + $0xc0] sm:$0xff]   ;;  %v1768_v38 = vld [vmem:[%s2373_s0 + $0x1f8] sm:$0xff]  }
   0xb   :  { %v1755_v27 = vld [vmem:[%s2373_s0 + $0x8] sm:$0xff]   ;;  %v1759_v31 = vld [vmem:[%s2373_s0] sm:$0xff]   ;;  %v1769_v39 = vld [vmem:[%s2373_s0 + $0x138] sm:$0xff]  }
   0xc   :  { %1501 = vmatpush3.bf16.msra.mxu0 %v1739_v11  ;;  %v1756_v28 = vld [vmem:[%s2373_s0 + $0x88] sm:$0xff]   ;;  %v1760_v32 = vld [vmem:[%s2373_s0 + $0x80] sm:$0xff]   ;;  %v1770_v40 = vld [vmem:[%s2373_s0 + $0x1b8] sm:$0xff]  }
   0xd   :  { %1529 = vmatpush3.bf16.msra.mxu1 %v1740_v12  ;;  %1502 = vmatprep.subr.bf16.mxu0 %v1741_v13  ;;  %v2014_v33 = vld [vmem:[%s2374_s1] ss:$16 sps:$4 sm:$0xff]   ;;  %v1763_v34 = vld [vmem:[%s2374_s1 + $0x4] ss:$16 sps:$4 sm:$0xff]   ;;  %v2022_v35 = vld [vmem:[%s2374_s1 + $0x8] ss:$16 sps:$4 sm:$0xff]  }
   0xe   :  { %1530 = vmatprep.subr.bf16.mxu1 %v1742_v14  ;;  %v1766_v36 = vld [vmem:[%s2374_s1 + $0xc] ss:$16 sps:$4 sm:$0xff]   ;;  %426 = vmatprep.mubr.bf16.mxu0 %v1763_v34  ;;  %v1771_v41 = vld [vmem:[%s2373_s0 + $0x170] sm:$0xff]   ;;  %v1779_v49 = vld [vmem:[%s2373_s0 + $0x160] sm:$0xff]  }
   0xf   :  { %475 = vmatprep.mubr.bf16.mxu1 %v1766_v36  ;;  %v1772_v42 = vld [vmem:[%s2373_s0 + $0x1f0] sm:$0xff]   ;;  %v1775_v45 = vld [vmem:[%s2373_s0 + $0x168] sm:$0xff]   ;;  %v1780_v50 = vld [vmem:[%s2373_s0 + $0x1e0] sm:$0xff]  }
  0x10   :  { %1503 = vmatpush3.bf16.msra.mxu0 %v1743_v15  ;;  %v1773_v43 = vld [vmem:[%s2373_s0 + $0x130] sm:$0xff]   ;;  %v1776_v46 = vld [vmem:[%s2373_s0 + $0x1e8] sm:$0xff]   ;;  %v1781_v51 = vld [vmem:[%s2373_s0 + $0x120] sm:$0xff]  }
  0x11   :  { %1531 = vmatpush3.bf16.msra.mxu1 %v1744_v16  ;;  %1504 = vmatprep.subr.bf16.mxu0 %v1745_v17  ;;  %v1774_v44 = vld [vmem:[%s2373_s0 + $0x1b0] sm:$0xff]   ;;  %v1777_v47 = vld [vmem:[%s2373_s0 + $0x128] sm:$0xff]   ;;  %v1782_v52 = vld [vmem:[%s2373_s0 + $0x1a0] sm:$0xff]  }
  0x12   :  { %1532 = vmatprep.subr.bf16.mxu1 %v1746_v18  ;;  %v1778_v48 = vld [vmem:[%s2373_s0 + $0x1a8] sm:$0xff]   ;;  %v1783_v53 = vld [vmem:[%s2373_s0 + $0x158] sm:$0xff]   ;;  %v1785_v55 = vld [vmem:[%s2374_s1 + $0x24] ss:$16 sps:$4 sm:$0xff]  }
  0x13   :  { %v1784_v54 = vld [vmem:[%s2373_s0 + $0x1d8] sm:$0xff]   ;;  %v1791_v59 = vld [vmem:[%s2374_s1 + $0x20] ss:$16 sps:$4 sm:$0xff]   ;;  %v1797_v1 = vld [vmem:[%s2373_s0 + $0x148] sm:$0xff]  }
  0x14   :  { %1505 = vmatpush3.bf16.msra.mxu0 %v1747_v19  ;;  %v1787_v56 = vld [vmem:[%s2374_s1 + $0x2c] ss:$16 sps:$4 sm:$0xff]   ;;  %v1792_v60 = vld [vmem:[%s2374_s1 + $0x28] ss:$16 sps:$4 sm:$0xff]   ;;  %v1793_v61 = vld [vmem:[%s2373_s0 + $0x150] sm:$0xff]  }
  0x15   :  { %1533 = vmatpush3.bf16.msra.mxu1 %v1748_v20  ;;  %1506 = vmatprep.subr.bf16.mxu0 %v1749_v21  ;;  %v1789_v57 = vld [vmem:[%s2373_s0 + $0x118] sm:$0xff]   ;;  %v1794_v62 = vld [vmem:[%s2373_s0 + $0x1d0] sm:$0xff]   ;;  %v1798_v3 = vld [vmem:[%s2373_s0 + $0x1c8] sm:$0xff]  }
  0x16   :  { %1534 = vmatprep.subr.bf16.mxu1 %v1750_v22  ;;  %v1790_v58 = vld [vmem:[%s2373_s0 + $0x198] sm:$0xff]   ;;  %v1795_v63 = vld [vmem:[%s2373_s0 + $0x110] sm:$0xff]   ;;  %v1799_v4 = vld [vmem:[%s2373_s0 + $0x108] sm:$0xff]  }
  0x17   :  { %v1796_v0 = vld [vmem:[%s2373_s0 + $0x190] sm:$0xff]   ;;  %v1800_v5 = vld [vmem:[%s2373_s0 + $0x188] sm:$0xff]   ;;  %v1801_v6 = vld [vmem:[%s2373_s0 + $0x140] sm:$0xff]  }
  0x18   :  { %1507 = vmatpush3.bf16.msra.mxu0 %v1751_v23  ;;  %v1802_v7 = vld [vmem:[%s2373_s0 + $0x1c0] sm:$0xff]   ;;  %v49_v12 = vld [vmem:[%s2375_s2 + $0x8] sm:$0xff]  ;;  %v50_v13 = vld [vmem:[%s2375_s2 + $0x10] sm:$0xff] }
  0x19   :  { %1535 = vmatpush3.bf16.msra.mxu1 %v1752_v24  ;;  %1508 = vmatprep.subr.bf16.mxu0 %v1753_v25  ;;  %v1803_v8 = vld [vmem:[%s2373_s0 + $0x100] sm:$0xff]   ;;  %v73_v14 = vld [vmem:[%s2376_s3 + $0x8] sm:$0xff] }
  0x1a   :  { %1536 = vmatprep.subr.bf16.mxu1 %v1754_v26  ;;  %v1804_v9 = vld [vmem:[%s2373_s0 + $0x180] sm:$0xff]  }
  0x1b   :  { %v48_v10 = vld [vmem:[%s2375_s2] sm:$0xff] }
  0x1c   :  { %1509 = vmatpush3.bf16.msra.mxu0 %v1755_v27  ;;  %v72_v11 = vld [vmem:[%s2376_s3] sm:$0xff]  ;;  %54 = vperm.xlu0 %1727, %v48_v10  }
  0x1d   :  { %1537 = vmatpush3.bf16.msra.mxu1 %v1756_v28  ;;  %1510 = vmatprep.subr.bf16.mxu0 %v1757_v29 }
  0x1e   :  { %1538 = vmatprep.subr.bf16.mxu1 %v1758_v30  ;;  %78 = vperm.xlu1 %1728, %v72_v11  }
  0x20   :  { %1511 = vmatpush3.bf16.msra.mxu0 %v1759_v31  ;;  %59 = vperm.xlu0 %1727, %v49_v12  }
  0x21   :  { %1539 = vmatpush3.bf16.msra.mxu1 %v1760_v32  ;;  %1552 = vmatprep.subr.bf16.mxu0 %v1767_v37 }
  0x22   :  { %1580 = vmatprep.subr.bf16.mxu1 %v1768_v38  ;;  %64 = vperm.xlu1 %1728, %v50_v13  }
  0x23   :  { %427 = vmatmul.mubr.bf16.vlgmr.msra.gmra.mxu0 %v2014_v33 }
  0x24   :  { %476 = vmatmul.mubr.bf16.vlgmr.msra.gmra.mxu1 %v2022_v35  ;;  %1553 = vmatpush3.bf16.msra.mxu0 %v1769_v39 }
  0x25   :  { %1581 = vmatpush3.bf16.msra.mxu1 %v1770_v40  ;;  %1554 = vmatprep.subr.bf16.mxu0 %v1771_v41 }
  0x26   :  { %1582 = vmatprep.subr.bf16.mxu1 %v1772_v42  ;;  %434 = vmatprep.mubr.bf16.mxu0 %v1785_v55 }
  0x27   :  { %483 = vmatprep.mubr.bf16.mxu1 %v1787_v56 }
  0x28   :  { %1555 = vmatpush3.bf16.msra.mxu0 %v1773_v43 }
  0x29   :  { %1583 = vmatpush3.bf16.msra.mxu1 %v1774_v44  ;;  %1556 = vmatprep.subr.bf16.mxu0 %v1775_v45 }
  0x2a   :  { %1584 = vmatprep.subr.bf16.mxu1 %v1776_v46 }
  0x2b   :  { %435 = vmatmul.mubr.bf16.gmra.mxu0 %v1791_v59 }
  0x2c   :  { %1557 = vmatpush3.bf16.msra.mxu0 %v1777_v47  ;;  %484 = vmatmul.mubr.bf16.gmra.mxu1 %v1792_v60 }
  0x2d   :  { %1585 = vmatpush3.bf16.msra.mxu1 %v1778_v48  ;;  %1558 = vmatprep.subr.bf16.mxu0 %v1779_v49 }
  0x2e   :  { %1586 = vmatprep.subr.bf16.mxu1 %v1780_v50  ;;  %817 = vmatprep.mubr.bf16.mxu0 %v1763_v34 }
  0x2f   :  { %866 = vmatprep.mubr.bf16.mxu1 %v1766_v36 }
  0x30   :  { %1559 = vmatpush3.bf16.msra.mxu0 %v1781_v51 }
  0x31   :  { %1587 = vmatpush3.bf16.msra.mxu1 %v1782_v52  ;;  %1560 = vmatprep.subr.bf16.mxu0 %v1783_v53 }
  0x32   :  { %1588 = vmatprep.subr.bf16.mxu1 %v1784_v54 }
  0x34   :  { %1561 = vmatpush3.bf16.msra.mxu0 %v1789_v57 }
  0x35   :  { %1589 = vmatpush3.bf16.msra.mxu1 %v1790_v58  ;;  %1562 = vmatprep.subr.bf16.mxu0 %v1793_v61 }
  0x36   :  { %1590 = vmatprep.subr.bf16.mxu1 %v1794_v62 }
  0x38   :  { %1563 = vmatpush3.bf16.msra.mxu0 %v1795_v63 }
  0x39   :  { %1591 = vmatpush3.bf16.msra.mxu1 %v1796_v0  ;;  %1564 = vmatprep.subr.bf16.mxu0 %v1797_v1 }
  0x3a   :  { %1592 = vmatprep.subr.bf16.mxu1 %v1798_v3 }
  0x3c   :  { %1565 = vmatpush3.bf16.msra.mxu0 %v1799_v4 }
  0x3d   :  { %1593 = vmatpush3.bf16.msra.mxu1 %v1800_v5  ;;  %1566 = vmatprep.subr.bf16.mxu0 %v1801_v6 }
  0x3e   :  { %1594 = vmatprep.subr.bf16.mxu1 %v1802_v7 }
  0x40   :  { %1567 = vmatpush3.bf16.msra.mxu0 %v1803_v8 }
  0x41   :  { %1595 = vmatpush3.bf16.msra.mxu1 %v1804_v9 }
  0x43   :  { %818 = vmatmul.mubr.bf16.vlgmr.msra.gmra.mxu0 %v2014_v33 }
  0x44   :  { %867 = vmatmul.mubr.bf16.vlgmr.msra.gmra.mxu1 %v2022_v35  ;;  %825 = vmatprep.mubr.bf16.mxu0 %v1785_v55 }
  0x45   :  { %874 = vmatprep.mubr.bf16.mxu1 %v1787_v56 }
  0x46   :  { %16 = vsyncpa [#allocation3], 0  ;;  %v51_v15 = vld [vmem:[%s2375_s2 + $0x18] sm:$0xff]  ;;  %83 = vperm.xlu0 %1727, %v73_v14   ;;  %v74_v16 = vld [vmem:[%s2376_s3 + $0x10] sm:$0xff]  ;;  %vm504_vm0 = vcmask 523264   ;;  %vm1851_vm3 = vmmov 0  }
  0x47   :  { %69 = vperm.xlu1 %1728, %v51_v15   ;;  %v75_v17 = vld [vmem:[%s2376_s3 + $0x18] sm:$0xff]  ;;  %vm967_vm4 = vcmask 261120   ;;  %vm1133_vm5 = vcmask 1041408  }
  0x4a   :  { %88 = vperm.xlu0 %1727, %v74_v16  }
  0x4b   :  { %826 = vmatmul.mubr.bf16.gmra.mxu0 %v1791_v59  ;;  %93 = vperm.xlu1 %1728, %v75_v17  }
  0x4c   :  { %875 = vmatmul.mubr.bf16.gmra.mxu1 %v1792_v60 }
  0x4d   :  { %1124 = vmatprep.mubr.bf16.mxu1 %v1849_v2 }
  0x97   :  { %v55_v18 = vpop.permute.xlu0 %54 }
  0x99   :  { %v79_v32 = vpop.permute.xlu1 %78 }
  0x9b   :  { %v60_v27 = vpop.permute.xlu0 %59 }
  0x9d   :  { %v65_v52 = vpop.permute.xlu1 %64 }
  0xc1   :  { %v84_v36 = vpop.permute.xlu0 %83 }
  0xc2   :  { %v70_v1 = vpop.permute.xlu1 %69 }
  0xc5   :  { %v89_v5 = vpop.permute.xlu0 %88 }
  0xe3   :  { %v1512_v19 = vpop.f32.mrf.mxu0 }
  0xe4   :  { %v1540_v20 = vpop.f32.mrf.mxu1 }
  0xe5   :  { %v1513_v21 = vpop.f32.mrf.mxu0 }
  0xe6   :  { %v1514_v22 = vadd.f32 %v1513_v21, %v1512_v19  ;;  %v1541_v23 = vpop.f32.mrf.mxu1 }
  0xe7   :  { %v1542_v24 = vadd.f32 %v1541_v23, %v1540_v20  ;;  %v1515_v25 = vpop.f32.mrf.mxu0  ;;  %v94_v20 = vpop.permute.xlu1 %93 }
  0xe8   :  { %v1543_v26 = vpop.f32.mrf.mxu1 }
  0xe9   :  { %v478_v28 = vadd.f32 %v1542_v24, %v1514_v22  ;;  %v1516_v29 = vpop.f32.mrf.mxu0 }
  0xea   :  { %v1517_v30 = vadd.f32 %v1516_v29, %v1515_v25  ;;  %v1544_v31 = vpop.f32.mrf.mxu1 }
  0xeb   :  { %v492_v33 = vmul.f32 %v478_v28, %v55_v18  ;;  %v1545_v34 = vadd.f32 %v1544_v31, %v1543_v26  ;;  %v1518_v43 = vpop.f32.mrf.mxu0 }
  0xec   :  { %v1546_v44 = vpop.f32.mrf.mxu1 }
  0xed   :  { %v481_v35 = vadd.f32 %v1545_v34, %v1517_v30  ;;  %v496_v2 = vadd.f32 %v492_v33, %v79_v32  ;;  %v1519_v45 = vpop.f32.mrf.mxu0 }
  0xee   :  { %v1547_v46 = vpop.f32.mrf.mxu1  ;;  %v1520_v49 = vadd.f32 %v1519_v45, %v1518_v43 }
  0xef   :  { %v500_v37 = vmax.f32 %v496_v2, 0.0  ;;  %v493_v38 = vmul.f32 %v481_v35, %v60_v27  ;;  %v1521_v47 = vpop.f32.mrf.mxu0  ;;  %v1548_v50 = vadd.f32 %v1547_v46, %v1546_v44 }
  0xf0   :  { %v1549_v48 = vpop.f32.mrf.mxu1 }
  0xf1   :  { %v497_v39 = vadd.f32 %v493_v38, %v84_v36  ;;  %v505_v40 = vsel %vm504_vm0, %v500_v37, 0.0  ;;  %v1522_v51 = vpop.f32.mrf.mxu0  ;;  %v486_v55 = vadd.f32 %v1548_v50, %v1520_v49  ;;  %v1805_v49 = vld [vmem:[%s2377_s4 + $0x8] sm:$0xff]   ;;  %v1850_v50 = vmov 0.0  }
  0xf2   :  { %506 = vadd.xlane.f32.xlu0 %v505_v40  ;;  %v1550_v53 = vpop.f32.mrf.mxu1  ;;  %v1523_v57 = vadd.f32 %v1522_v51, %v1521_v47  ;;  %1645 = vmatprep.subr.bf16.mxu0 %v1850_v50  ;;  %v1806_v51 = vld [vmem:[%s2377_s4] sm:$0xff]  }
  0xf3   :  { %v501_v41 = vmax.f32 %v497_v39, 0.0  ;;  %v1551_v58 = vadd.f32 %v1550_v53, %v1549_v48  ;;  %v494_v0 = vmul.f32 %v486_v55, %v65_v52  ;;  %1646 = vmatpush3.bf16.msra.mxu0 %v1805_v49  ;;  %1649 = vmatprep.mubr.msk.bf16.mxu0 %vm1851_vm3, %v1850_v50  ;;  %v1170_v49 = vld [vmem:[%s2382_s9 + $0x70] sm:$0xff] }
  0xf4   :  { %1647 = vmatprep.subr.bf16.mxu0 %v1850_v50 }
  0xf5   :  { %v508_v42 = vsel %vm504_vm0, %v501_v41, 0.0  ;;  %v489_v4 = vadd.f32 %v1551_v58, %v1523_v57  ;;  %v498_v13 = vadd.f32 %v494_v0, %v89_v5 }
  0xf6   :  { %509 = vadd.xlane.f32.xlu0 %v508_v42 }
  0xf7   :  { %v495_v15 = vmul.f32 %v489_v4, %v70_v1  ;;  %v502_v28 = vmax.f32 %v498_v13, 0.0  ;;  %1648 = vmatpush3.bf16.msra.mxu0 %v1806_v51  ;;  %v1257_v51 = vld [vmem:[%s2383_s10 + $0x78] sm:$0xff] }
  0xf8   :  { %1653 = vmatprep.subr.mxu0 %v1850_v50 }
  0xf9   :  { %v499_v30 = vadd.f32 %v495_v15, %v94_v20  ;;  %v511_v39 = vsel %vm504_vm0, %v502_v28, 0.0 }
 0x103   :  { %v1568_v54 = vpop.f32.mrf.mxu0 }
 0x104   :  { %v1596_v56 = vpop.f32.mrf.mxu1 }
 0x105   :  { %v1569_v59 = vpop.f32.mrf.mxu0 }
 0x106   :  { %v1570_v60 = vadd.f32 %v1569_v59, %v1568_v54  ;;  %v1597_v61 = vpop.f32.mrf.mxu1 }
 0x107   :  { %v1598_v62 = vadd.f32 %v1597_v61, %v1596_v56  ;;  %v1571_v63 = vpop.f32.mrf.mxu0 }
 0x108   :  { %v1599_v3 = vpop.f32.mrf.mxu1 }
 0x109   :  { %v869_v6 = vadd.f32 %v1598_v62, %v1570_v60  ;;  %v1572_v7 = vpop.f32.mrf.mxu0  ;;  %v1807_v62 = vld [vmem:[%s2380_s7 + $0x30] ss:$8 sps:$4 sm:$0xff]  }
 0x10a   :  { %v1573_v8 = vadd.f32 %v1572_v7, %v1571_v63  ;;  %v1600_v9 = vpop.f32.mrf.mxu1  ;;  %v1809_v63 = vld [vmem:[%s2380_s7 + $0x34] ss:$8 sps:$4 sm:$0xff]   ;;  %v1810_v7 = vld [vmem:[%s2380_s7 + $0x20] ss:$8 sps:$4 sm:$0xff]  }
 0x10b   :  { %v883_v10 = vmul.f32 %v869_v6, %v55_v18  ;;  %v1601_v11 = vadd.f32 %v1600_v9, %v1599_v3  ;;  %v1574_v12 = vpop.f32.mrf.mxu0  ;;  %v1812_v3 = vld [vmem:[%s2380_s7 + $0x24] ss:$8 sps:$4 sm:$0xff]   ;;  %1100 = vmatprep.subr.bf16.mxu1 %v1809_v63 }
 0x10c   :  { %v1602_v14 = vpop.f32.mrf.mxu1  ;;  %1101 = vmatpush1.bf16.msra.mxu1 %v1807_v62  ;;  %v1164_v62 = vld [vmem:[%s2382_s9 + $0x40] sm:$0xff] }
 0x10d   :  { %v872_v16 = vadd.f32 %v1601_v11, %v1573_v8  ;;  %v1575_v17 = vpop.f32.mrf.mxu0  ;;  %v887_v19 = vadd.f32 %v883_v10, %v79_v32  ;;  %1102 = vmatprep.subr.bf16.mxu1 %v1812_v3 }
 0x10e   :  { %v1576_v21 = vadd.f32 %v1575_v17, %v1574_v12  ;;  %v1603_v22 = vpop.f32.mrf.mxu1 }
 0x10f   :  { %v884_v23 = vmul.f32 %v872_v16, %v60_v27  ;;  %v1604_v24 = vadd.f32 %v1603_v22, %v1602_v14  ;;  %v1577_v25 = vpop.f32.mrf.mxu0  ;;  %v891_v26 = vmax.f32 %v887_v19, 0.0  ;;  %v503_v27 = vmax.f32 %v499_v30, 0.0  ;;  %v1815_v22 = vld [vmem:[%s2380_s7 + $0x14] ss:$8 sps:$4 sm:$0xff]  }
 0x110   :  { %v1605_v29 = vpop.f32.mrf.mxu1  ;;  %1103 = vmatpush1.bf16.msra.mxu1 %v1810_v7 }
 0x111   :  { %v877_v31 = vadd.f32 %v1604_v24, %v1576_v21  ;;  %v1578_v18 = vpop.f32.mrf.mxu0  ;;  %v895_v33 = vsel %vm504_vm0, %v891_v26, 0.0  ;;  %v888_v34 = vadd.f32 %v884_v23, %v84_v36  ;;  %v514_v45 = vsel %vm504_vm0, %v503_v27, 0.0  ;;  %v1813_v23 = vld [vmem:[%s2380_s7 + $0x10] ss:$8 sps:$4 sm:$0xff]   ;;  %1104 = vmatprep.subr.bf16.mxu1 %v1815_v22  ;;  %v1818_v24 = vld [vmem:[%s2380_s7 + $0x4] ss:$8 sps:$4 sm:$0xff]  }
 0x112   :  { %v1579_v35 = vadd.f32 %v1578_v18, %v1577_v25  ;;  %v1606_v2 = vpop.f32.mrf.mxu1  ;;  %896 = vadd.xlane.f32.xlu1 %v895_v33  ;;  %v1816_v25 = vld [vmem:[%s2380_s7] ss:$8 sps:$4 sm:$0xff]  }
 0x113   :  { %v885_v37 = vmul.f32 %v877_v31, %v65_v52  ;;  %v1607_v32 = vadd.f32 %v1606_v2, %v1605_v29  ;;  %v892_v38 = vmax.f32 %v888_v34, 0.0  ;;  %v96_v52 = vlaneseq  ;;  %v1485_v26 = vld [vmem:[%s2378_s5] ss:$0 sm:$0xff] }
 0x114   :  { %1105 = vmatpush1.bf16.msra.mxu1 %v1813_v23  ;;  %v1486_v29 = vld [vmem:[%s2379_s6] ss:$0 sm:$0xff]  ;;  %v1157_v23 = vld [vmem:[%s2382_s9 + $0x8] sm:$0xff] }
 0x115   :  { %v880_v40 = vadd.f32 %v1607_v32, %v1579_v35  ;;  %v898_v41 = vsel %vm504_vm0, %v892_v38, 0.0  ;;  %v889_v42 = vadd.f32 %v885_v37, %v89_v5  ;;  %v97_v54 = vand.u32 127, %v96_v52  ;;  %1106 = vmatprep.subr.bf16.mxu1 %v1818_v24  ;;  %v1037_v38 = vld [vmem:[%s2381_s8] sm:$0x3]  ;;  %v1245_v24 = vld [vmem:[%s2383_s10 + $0x18] sm:$0xff] }
 0x116   :  { %512 = vadd.xlane.f32.xlu1 %v511_v39  ;;  %899 = vadd.xlane.f32.xlu0 %v898_v41  ;;  %v1040_v37 = vshrl.u32 %v96_v52, 7  ;;  %v1256_v52 = vld [vmem:[%s2383_s10 + $0x70] sm:$0xff]  ;;  %v1246_v22 = vld [vmem:[%s2383_s10 + $0x20] sm:$0xff] }
 0x117   :  { %v886_v43 = vmul.f32 %v880_v40, %v70_v1  ;;  %v893_v44 = vmax.f32 %v889_v42, 0.0  ;;  %vm521_vm1 = vcmp.eq.s32.totalorder %v97_v54, 0  ;;  %vm911_vm2 = vcmp.eq.s32.totalorder %v97_v54, 1  ;;  %v1255_v54 = vld [vmem:[%s2383_s10 + $0x68] sm:$0xff] }
 0x118   :  { %1107 = vmatpush1.bf16.msra.mxu1 %v1816_v25  ;;  %v1041_v32 = vsub.s32 0, %v1040_v37  ;;  %v1045_v39 = vsub.s32 1, %v1040_v37  ;;  %v1156_v25 = vld [vmem:[%s2382_s9] sm:$0xff] }
 0x119   :  { %v901_v36 = vsel %vm504_vm0, %v893_v44, 0.0  ;;  %v890_v46 = vadd.f32 %v886_v43, %v94_v20  ;;  %1688 = vmatprep.subr.mxu1 %v1850_v50 }
 0x11a   :  { %515 = vadd.xlane.f32.xlu1 %v514_v45  ;;  %902 = vadd.xlane.f32.xlu0 %v901_v36  ;;  %v1042_v27 = vrot.slane %v1037_v38, %v1041_v32  ;;  %v1046_v40 = vrot.slane %v1037_v38, %v1045_v39 }
 0x11b   :  { %v894_v47 = vmax.f32 %v890_v46, 0.0 }
 0x11d   :  { %v904_v48 = vsel %vm504_vm0, %v894_v47, 0.0 }
 0x11e   :  { %905 = vadd.xlane.f32.xlu0 %v904_v48  ;;  %v1171_v48 = vld [vmem:[%s2382_s9 + $0x78] sm:$0xff] }
 0x17b   :  { %v507_v53 = vpop.xlane.xlu0 %506 }
 0x17c   :  { %v517_v55 = vmul.f32 0.015625, %v507_v53  ;;  %v1169_v53 = vld [vmem:[%s2382_s9 + $0x68] sm:$0xff] }
 0x17e   :  { %v524_v59 = vsel %vm521_vm1, %v517_v55, 0.0  ;;  %v1168_v55 = vld [vmem:[%s2382_s9 + $0x60] sm:$0xff] }
 0x17f   :  { %v510_v56 = vpop.xlane.xlu0 %509 }
 0x180   :  { %v518_v60 = vmul.f32 0.015625, %v510_v56  ;;  %v1254_v56 = vld [vmem:[%s2383_s10 + $0x60] sm:$0xff] }
 0x182   :  { %v525_v5 = vsel %vm521_vm1, %v518_v60, 0.0  ;;  %v1252_v60 = vld [vmem:[%s2383_s10 + $0x50] sm:$0xff] }
 0x19b   :  { %v897_v57 = vpop.xlane.xlu1 %896 }
 0x19c   :  { %v907_v58 = vmul.f32 0.015625, %v897_v57  ;;  %v1167_v57 = vld [vmem:[%s2382_s9 + $0x58] sm:$0xff] }
 0x19e   :  { %v914_v61 = vsel %vm911_vm2, %v907_v58, %v524_v59  ;;  %v1253_v58 = vld [vmem:[%s2383_s10 + $0x58] sm:$0xff]  ;;  %v1166_v59 = vld [vmem:[%s2382_s9 + $0x50] sm:$0xff] }
 0x19f   :  { %v513_v0 = vpop.xlane.xlu1 %512  ;;  %918 = vxpose.xlu1.b32.start [1/4] (short) (narrow) %v914_v61, 8  ;;  %v900_v1 = vpop.xlane.xlu0 %899  ;;  %v1165_v61 = vld [vmem:[%s2382_s9 + $0x48] sm:$0xff] }
 0x1a0   :  { %v908_v4 = vmul.f32 0.015625, %v900_v1  ;;  %v519_v6 = vmul.f32 0.015625, %v513_v0 }
 0x1a2   :  { %v915_v8 = vsel %vm911_vm2, %v908_v4, %v525_v5  ;;  %v526_v12 = vsel %vm521_vm1, %v519_v6, 0.0 }
 0x1a3   :  { %v516_v9 = vpop.xlane.xlu1 %515  ;;  %919 = vxpose.xlu1.b32.cont [2/4] (short) (narrow) %v915_v8, 8  ;;  %v903_v10 = vpop.xlane.xlu0 %902 }
 0x1a4   :  { %v909_v11 = vmul.f32 0.015625, %v903_v10  ;;  %v520_v13 = vmul.f32 0.015625, %v516_v9  ;;  %v1163_v10 = vld [vmem:[%s2382_s9 + $0x38] sm:$0xff] }
 0x1a6   :  { %v916_v14 = vsel %vm911_vm2, %v909_v11, %v526_v12  ;;  %v527_v17 = vsel %vm521_vm1, %v520_v13, 0.0  ;;  %v1251_v11 = vld [vmem:[%s2383_s10 + $0x48] sm:$0xff]  ;;  %v1162_v12 = vld [vmem:[%s2382_s9 + $0x30] sm:$0xff]  ;;  %v1250_v13 = vld [vmem:[%s2383_s10 + $0x40] sm:$0xff] }
 0x1a7   :  { %920 = vxpose.xlu1.b32.cont [3/4] (short) (narrow) %v916_v14, 8  ;;  %v906_v15 = vpop.xlane.xlu0 %905  ;;  %v1161_v14 = vld [vmem:[%s2382_s9 + $0x28] sm:$0xff] }
 0x1a8   :  { %v910_v16 = vmul.f32 0.015625, %v906_v15  ;;  %v1249_v15 = vld [vmem:[%s2383_s10 + $0x38] sm:$0xff] }
 0x1aa   :  { %v917_v19 = vsel %vm911_vm2, %v910_v16, %v527_v17  ;;  %v1160_v16 = vld [vmem:[%s2382_s9 + $0x20] sm:$0xff]  ;;  %v1248_v17 = vld [vmem:[%s2383_s10 + $0x30] sm:$0xff] }
 0x1ab   :  { %921 = vxpose.xlu1.b32.end [4/4] (short) (narrow) %v917_v19, 8  ;;  %v1159_v19 = vld [vmem:[%s2382_s9 + $0x18] sm:$0xff] }
 0x21b   :  { %v934_v20 = vpop.trf.xlu1 }
 0x21c   :  { %v950_v21 = vpack.c.bf16 %v934_v20, %v934_v20  ;;  %v1247_v20 = vld [vmem:[%s2383_s10 + $0x28] sm:$0xff] }
 0x21e   :  { %1650 = vmatmul.mubr.msk.bf16.vlgmr.msra.gmra.mxu0 %vm967_vm4, %v950_v21  ;;  %v1158_v21 = vld [vmem:[%s2382_s9 + $0x10] sm:$0xff] }
 0x21f   :  { %1685 = vmatprep.mubr.msk.f32.mxu0 %vm1851_vm3, %v1850_v50  ;;  %1654 = vmatpush3.msra.mxu0 %v1171_v48 }
 0x220   :  { %1655 = vmatprep.subr.mxu0 %v1850_v50 }
 0x221   :  { %1656 = vmatpush3.msra.mxu0 %v1170_v49 }
 0x222   :  { %1657 = vmatprep.subr.mxu0 %v1850_v50 }
 0x223   :  { %1658 = vmatpush3.msra.mxu0 %v1169_v53 }
 0x224   :  { %1659 = vmatprep.subr.mxu0 %v1850_v50 }
 0x225   :  { %1660 = vmatpush3.msra.mxu0 %v1168_v55 }
 0x226   :  { %1661 = vmatprep.subr.mxu0 %v1850_v50 }
 0x227   :  { %1662 = vmatpush3.msra.mxu0 %v1167_v57 }
 0x228   :  { %1663 = vmatprep.subr.mxu0 %v1850_v50 }
 0x229   :  { %1664 = vmatpush3.msra.mxu0 %v1166_v59 }
 0x22a   :  { %1665 = vmatprep.subr.mxu0 %v1850_v50 }
 0x22b   :  { %1666 = vmatpush3.msra.mxu0 %v1165_v61 }
 0x22c   :  { %1667 = vmatprep.subr.mxu0 %v1850_v50 }
 0x22d   :  { %1668 = vmatpush3.msra.mxu0 %v1164_v62 }
 0x22e   :  { %1669 = vmatprep.subr.mxu0 %v1850_v50 }
 0x22f   :  { %1670 = vmatpush3.msra.mxu0 %v1163_v10 }
 0x230   :  { %1671 = vmatprep.subr.mxu0 %v1850_v50 }
 0x231   :  { %1672 = vmatpush3.msra.mxu0 %v1162_v12 }
 0x232   :  { %1673 = vmatprep.subr.mxu0 %v1850_v50 }
 0x233   :  { %1674 = vmatpush3.msra.mxu0 %v1161_v14 }
 0x234   :  { %1675 = vmatprep.subr.mxu0 %v1850_v50 }
 0x235   :  { %1676 = vmatpush3.msra.mxu0 %v1160_v16 }
 0x236   :  { %1677 = vmatprep.subr.mxu0 %v1850_v50 }
 0x237   :  { %1678 = vmatpush3.msra.mxu0 %v1159_v19 }
 0x238   :  { %1679 = vmatprep.subr.mxu0 %v1850_v50 }
 0x239   :  { %1680 = vmatpush3.msra.mxu0 %v1158_v21 }
 0x23a   :  { %1681 = vmatprep.subr.mxu0 %v1850_v50 }
 0x23b   :  { %1682 = vmatpush3.msra.mxu0 %v1157_v23 }
 0x23c   :  { %1683 = vmatprep.subr.mxu0 %v1850_v50 }
 0x23d   :  { %1684 = vmatpush3.msra.mxu0 %v1156_v25 }
 0x2de   :  { %v1005_v28 = vpop.f32.mrf.mxu0 }
 0x2df   :  { %v1018_v30 = vmul.f32 %v1485_v26, %v1005_v28  ;;  %v1244_v26 = vld [vmem:[%s2383_s10 + $0x10] sm:$0xff]  ;;  %v1243_v28 = vld [vmem:[%s2383_s10 + $0x8] sm:$0xff] }
 0x2e0   :  { %v1651_v31 = vpop.f32.mrf.mxu0 }
 0x2e1   :  { %v1026_v18 = vadd.f32 %v1486_v29, %v1018_v30  ;;  %v1242_v29 = vld [vmem:[%s2383_s10] sm:$0xff]  ;;  %s1852_s10 = smov [#allocation2]  }
 0x2e2   :  { %v1008_v33 = vpop.f32.mrf.mxu0  ;;  %s1338_s24 = sshll.u32 %s1852_s10, 4  ;;  %s1339_s24 = int_to_ptr.vmem [resolvable:$true] %s1338_s24 }
 0x2e3   :  { %v1027_v34 = vmax.f32 %v1026_v18, 0.0  ;;  %s1827_s25 = scalar_lea.vmem %s1339_s24, 96  ;;  %p1832_p1 = scmp.lt.s32.totalorder %s1339_s24, %s1339_s24 }
 0x2e4   :  { %v1652_v35 = vpop.f32.mrf.mxu0  ;;  %p1828_p0 = scmp.ne.s32.totalorder %s1339_s24, %s1827_s25  ;;  %p1833_p2 = scmp.lt.s32.totalorder %s1827_s25, %s1827_s25 }
 0x2e5   :  { %v1028_v2 = vpack.c.bf16 %v1027_v34, %v1027_v34 }
 0x2e6   :  { %p1834_p3 = por %p1833_p2, %p1832_p1 }
 0x2e7   :  { %1495 = vmatmul.mubr.msk.bf16.vlgmr.msra.gmra.mxu1 %vm504_vm0, %v1028_v2 }
 0x2e8   :  { %1720 = vmatprep.mubr.msk.f32.mxu1 %vm1851_vm3, %v1850_v50  ;;  %1689 = vmatpush3.msra.mxu1 %v1257_v51  ;;  %p1835_p4 = pnand %p1834_p3, %p1828_p0 }
 0x2e9   :  { %1690 = vmatprep.subr.mxu1 %v1850_v50 }
 0x2ea   :  { %1691 = vmatpush3.msra.mxu1 %v1256_v52 }
 0x2eb   :  { %1692 = vmatprep.subr.mxu1 %v1850_v50 }
 0x2ec   :  { %1693 = vmatpush3.msra.mxu1 %v1255_v54 }
 0x2ed   :  { %1694 = vmatprep.subr.mxu1 %v1850_v50 }
 0x2ee   :  { %1695 = vmatpush3.msra.mxu1 %v1254_v56 }
 0x2ef   :  { %1696 = vmatprep.subr.mxu1 %v1850_v50 }
 0x2f0   :  { %1697 = vmatpush3.msra.mxu1 %v1253_v58 }
 0x2f1   :  { %1698 = vmatprep.subr.mxu1 %v1850_v50 }
 0x2f2   :  { %1699 = vmatpush3.msra.mxu1 %v1252_v60 }
 0x2f3   :  { %1700 = vmatprep.subr.mxu1 %v1850_v50 }
 0x2f4   :  { %1701 = vmatpush3.msra.mxu1 %v1251_v11 }
 0x2f5   :  { %1702 = vmatprep.subr.mxu1 %v1850_v50 }
 0x2f6   :  { %1703 = vmatpush3.msra.mxu1 %v1250_v13 }
 0x2f7   :  { %1704 = vmatprep.subr.mxu1 %v1850_v50 }
 0x2f8   :  { %1705 = vmatpush3.msra.mxu1 %v1249_v15 }
 0x2f9   :  { %1706 = vmatprep.subr.mxu1 %v1850_v50 }
 0x2fa   :  { %1707 = vmatpush3.msra.mxu1 %v1248_v17 }
 0x2fb   :  { %1708 = vmatprep.subr.mxu1 %v1850_v50 }
 0x2fc   :  { %1709 = vmatpush3.msra.mxu1 %v1247_v20 }
 0x2fd   :  { %1710 = vmatprep.subr.mxu1 %v1850_v50 }
 0x2fe   :  { %1711 = vmatpush3.msra.mxu1 %v1246_v22 }
 0x2ff   :  { %1712 = vmatprep.subr.mxu1 %v1850_v50 }
 0x300   :  { %1713 = vmatpush3.msra.mxu1 %v1245_v24 }
 0x301   :  { %1714 = vmatprep.subr.mxu1 %v1850_v50 }
 0x302   :  { %1715 = vmatpush3.msra.mxu1 %v1244_v26 }
 0x303   :  { %1716 = vmatprep.subr.mxu1 %v1850_v50 }
 0x304   :  { %1717 = vmatpush3.msra.mxu1 %v1243_v28 }
 0x305   :  { %1718 = vmatprep.subr.mxu1 %v1850_v50 }
 0x306   :  { %1719 = vmatpush3.msra.mxu1 %v1242_v29 }
 0x3a7   :  { %v1126_v41 = vpop.f32.mrf.mxu1 }
 0x3a8   :  { %v1127_v42 = vadd.f32 %v1126_v41, %v1042_v27 }
 0x3a9   :  { %v1128_v43 = vpop.f32.mrf.mxu1 }
 0x3aa   :  { %v1129_v44 = vadd.f32 %v1128_v43, %v1046_v40  ;;  %v1134_v45 = vsel %vm1133_vm5, %v1127_v42, -inf }
 0x3ab   :  { %v1130_v36 = vpop.f32.mrf.mxu1  ;;  %1135 = vmax.xlane.f32.xlu0 %v1134_v45 }
 0x3ac   :  { %v1145_v47 = vsel %vm1133_vm5, %v1129_v44, -inf }
 0x3ad   :  { %v1131_v46 = vpop.f32.mrf.mxu1 }
 0x3af   :  { %1146 = vmax.xlane.f32.xlu0 %v1145_v47 }
 0x434   :  { %v1136_v63 = vpop.xlane.xlu0 %1135 }
 0x435   :  { %v1137_v0 = vsub.f32 %v1127_v42, %v1136_v63 }
 0x437   :  { %v1138_v1 = vmul.f32 1.442695, %v1137_v0 }
 0x438   :  { %v1147_v3 = vpop.xlane.xlu0 %1146 }
 0x439   :  { %1819 = vpow2.f32 %v1138_v1  ;;  %v1148_v4 = vsub.f32 %v1129_v44, %v1147_v3 }
 0x43b   :  { %v1149_v5 = vmul.f32 1.442695, %v1148_v4 }
 0x43d   :  { %1821 = vpow2.f32 %v1149_v5 }
 0x446   :  { %v2290_v6 = vpop.eup %1819 }
 0x447   :  { %v1140_v7 = vsel %vm1133_vm5, %v2290_v6, 0.0 }
 0x448   :  { %1141 = vadd.xlane.f32.xlu0 %v1140_v7 }
 0x44a   :  { %v2294_v8 = vpop.eup %1821 }
 0x44b   :  { %v1151_v9 = vsel %vm1133_vm5, %v2294_v8, 0.0 }
 0x44c   :  { %1152 = vadd.xlane.f32.xlu0 %v1151_v9 }
 0x4d1   :  { %v1142_v30 = vpop.xlane.xlu0 %1141 }
 0x4d2   :  { %1823 = vrcp.f32 %v1142_v30 }
 0x4d5   :  { %v1153_v31 = vpop.xlane.xlu0 %1152 }
 0x4d6   :  { %1825 = vrcp.f32 %v1153_v31 }
 0x4df   :  { %v1824_v18 = vpop.eup %1823 }
 0x4e0   :  { %v1144_v33 = vmul.f32 %v1824_v18, %v2290_v6 }
 0x4e2   :  { %1686 = vmatmul.mubr.f32.vlgmr.msra.gmra.mxu0 %v1144_v33  ;;  %1330 = vst [vmem:[#allocation2 + $0x2] sm:$0x3] %v1144_v33 }
 0x4e3   :  { %v1826_v34 = vpop.eup %1825 }
 0x4e4   :  { %v1155_v35 = vmul.f32 %v1826_v34, %v2294_v8 }
 0x4e6   :  { %1721 = vmatmul.mubr.f32.vlgmr.msra.gmra.mxu1 %v1155_v35  ;;  %1331 = vst [vmem:[#allocation2 + $0x4] sm:$0x3] %v1155_v35 }
 0x5a2   :  { %v1238_v2 = vpop.f32.mrf.mxu0 }
 0x5a4   :  { %v1687_v37 = vpop.f32.mrf.mxu0 }
 0x5a6   :  { %v1324_v50 = vpop.f32.mrf.mxu1 }
 0x5a7   :  { %v1328_v32 = vmul.f32 %v1324_v50, %v1238_v2 }
 0x5a8   :  { %v1722_v38 = vpop.f32.mrf.mxu1 }
 0x5a9   :  { %1329 = vst [vmem:[#allocation2] sm:$0x3] %v1328_v32 }
 0x5aa   :  { %1838 = shalt.err (!%p1835_p4)
}
 0x5ab   :  { %1341 = dma.vmem_to_hbm [thread:$0]  %s1339_s24, 96, %s2384_s11, [#allocation3]  }
 0x5ac   :  { %1847 = dma.done.wait [#allocation3], 96  }
 0x5ad   :  { %1848 = vsyncadd [#allocation3], 4294967200 }
 0x5ae   :  { %1345 = vsyncpa [#allocation3], 1 }

</bundles_post_ra>
